<compile_context>
chip_gen: v7x
topology: tpu7x:2x2x1
jax: 0.10.0
libtpu: 0.0.40
codegen_flags: <defaults>
</compile_context>

<pallas_src>
import functools

import jax
import jax.numpy as jnp
from jax import lax
from jax.experimental import pallas as pl
from jax.experimental.pallas import tpu as pltpu


def _round_up(x: int, m: int) -> int:
    return ((x + m - 1) // m) * m


def _pick_divisor_tile(dim: int, max_tile: int, align: int):
    """Largest t <= max_tile with t % align == 0 and dim % t == 0, else None."""
    t = (min(max_tile, dim) // align) * align
    while t >= align:
        if dim % t == 0:
            return t
        t -= align
    return None


def _linear_kernel_f32(x_ref, w_ref, b_ref, o_ref):
    # x_ref: [tm, tk]   w_ref: [tn, tk] (native [N, K])   b_ref: [1, tn]
    # o_ref: [tm, tn] float32, resident across the k grid axis.
    k = pl.program_id(2)
    partial = lax.dot_general(
        x_ref[...], w_ref[...],
        dimension_numbers=(((1,), (1,)), ((), ())),
        preferred_element_type=jnp.float32,
    )

    @pl.when(k == 0)
    def _first():
        # First K step: write (no zero-init store) and fuse the bias add.
        o_ref[...] = partial + b_ref[...].astype(jnp.float32)

    @pl.when(k != 0)
    def _rest():
        o_ref[...] += partial


def _linear_kernel_acc(x_ref, w_ref, b_ref, o_ref, acc_ref):
    # Non-f32 output: accumulate in an f32 VMEM scratch, cast once at the end.
    k = pl.program_id(2)
    partial = lax.dot_general(
        x_ref[...], w_ref[...],
        dimension_numbers=(((1,), (1,)), ((), ())),
        preferred_element_type=jnp.float32,
    )

    @pl.when(k == 0)
    def _first():
        acc_ref[...] = partial

    @pl.when(k != 0)
    def _rest():
        acc_ref[...] += partial

    @pl.when(k == pl.num_programs(2) - 1)
    def _epilogue():
        o_ref[...] = (acc_ref[...] + b_ref[...].astype(jnp.float32)).astype(
            o_ref.dtype
        )


@functools.partial(jax.jit, static_argnames=("max_tm", "max_tn", "max_tk"))
def fully_connected(x, weight, bias, *, max_tm=512, max_tn=512, max_tk=None):
    """y = x @ weight.T + bias, matching torch.nn.Linear.forward.

    x:      [B, K]
    weight: [N, K]   (native PyTorch layout — never transposed in HBM)
    bias:   [N]
    """
    B, K = x.shape
    N, K2 = weight.shape
    assert K == K2, (K, K2)
    assert bias.shape == (N,)

    in_item = jnp.dtype(x.dtype).itemsize
    out_dtype = x.dtype
    out_item = jnp.dtype(out_dtype).itemsize

    # dtype-aware sublane granularity: f32 -> 8, bf16 -> 16, int8/fp8 -> 32.
    sub = max(8, 32 // in_item)
    if max_tk is None:
        max_tk = {4: 2048, 2: 4096, 1: 8192}.get(in_item, 2048)

    # ---- M tiling: one tile covering the whole batch when feasible ---------
    if B <= max_tm:
        tm, Mp = B, B                                   # full-dim block
    else:
        tm = _pick_divisor_tile(B, max_tm, sub) or _round_up(max_tm, sub)
        Mp = _round_up(B, tm)

    # ---- K tiling: never pad the weight if a 128-multiple divisor exists ---
    if K <= max_tk:
        tk, Kp = K, K
    else:
        tk = _pick_divisor_tile(K, max_tk, 128) or (max_tk // 128) * 128
        Kp = _round_up(K, tk)

    # ---- N tiling -----------------------------------------------------------
    if N <= max_tn:
        tn, Np = N, N
    else:
        tn = _pick_divisor_tile(N, max_tn, 128) or (max_tn // 128) * 128
        Np = _round_up(N, tn)

    # v7x megacore: with a single M tile, split N into >= 2 parallel tiles so
    # both TensorCores get work (harmless on single-TC v5e/v6e).
    if Mp // tm == 1 and tn == Np and N >= 256:
        t2 = _pick_divisor_tile(N, pl.cdiv(N, 2), 128)
        if t2 is not None:
            tn = t2

    grid_m, grid_n, grid_k = Mp // tm, Np // tn, Kp // tk

    # ---- padding only when unavoidable (rare; x-row padding is cheap) ------
    xp = x if (Mp == B and Kp == K) else jnp.pad(x, ((0, Mp - B), (0, Kp - K)))
    wp = (weight if (Np == N and Kp == K)
          else jnp.pad(weight, ((0, Np - N), (0, Kp - K))))
    bp = (bias if Np == N else jnp.pad(bias, (0, Np - N))).reshape(1, Np)

    in_specs = [
        pl.BlockSpec((tm, tk), lambda i, j, k: (i, k)),   # x    [B, K]
        pl.BlockSpec((tn, tk), lambda i, j, k: (j, k)),   # W    [N, K] native
        pl.BlockSpec((1, tn), lambda i, j, k: (0, j)),    # bias [1, N]
    ]
    out_specs = pl.BlockSpec((tm, tn), lambda i, j, k: (i, j))

    f32_out = out_dtype == jnp.float32
    kernel = _linear_kernel_f32 if f32_out else _linear_kernel_acc
    scratch = [] if f32_out else [pltpu.VMEM((tm, tn), jnp.float32)]

    # VMEM budget from the actual tile footprint (double-buffered ins/outs +
    # accumulator), capped below v7x's 64 MiB physical VMEM.
    tile_bytes = (2 * (tm * tk + tn * tk + tn) * in_item
                  + 2 * tm * tn * out_item
                  + (0 if f32_out else tm * tn * 4))
    vmem_limit = min(64 * 1024 * 1024,
                     max(4 * 1024 * 1024, int(tile_bytes * 1.5) + (2 << 20)))

    cost = pl.CostEstimate(
        flops=2 * Mp * Np * Kp,
        transcendentals=0,
        bytes_accessed=(Mp * Kp * in_item * grid_n       # x re-streamed per N tile
                        + Np * Kp * in_item * grid_m     # W re-streamed per M tile
                        + Np * in_item * grid_m          # bias
                        + Mp * Np * out_item),           # output written once
    )

    out = pl.pallas_call(
        kernel,
        out_shape=jax.ShapeDtypeStruct((Mp, Np), out_dtype),
        grid_spec=pltpu.PrefetchScalarGridSpec(
            num_scalar_prefetch=0,
            grid=(grid_m, grid_n, grid_k),
            in_specs=in_specs,
            out_specs=out_specs,
            scratch_shapes=scratch,
        ),
        compiler_params=pltpu.CompilerParams(
            dimension_semantics=("parallel", "parallel", "arbitrary"),
            vmem_limit_bytes=vmem_limit,
        ),
        cost_estimate=cost,
    )(xp, wp, bp)

    if Mp != B or Np != N:
        out = out[:B, :N]
    return out
    # TODO(synk): for truly tiny problems a plain jnp.dot dispatch in the
    # caller avoids pallas_call fixed overhead; kept all-Pallas here so the
    # kernel path is always exercised.


if __name__ == "__main__":
    key = jax.random.PRNGKey(0)
    kx, kw, kb = jax.random.split(key, 3)

    # --- Small shapes consistent with the module: batch=8, in=32, out=16 ----
    batch, input_dim, output_dim = 8, 32, 16
    bound = 1.0 / (input_dim ** 0.5)     # nn.Linear default init range
    weight = jax.random.uniform(
        kw, (output_dim, input_dim), jnp.float32, minval=-bound, maxval=bound
    )
    bias = jax.random.uniform(
        kb, (output_dim,), jnp.float32, minval=-bound, maxval=bound
    )
    x = jax.random.normal(kx, (batch, input_dim), jnp.float32)

    y = jax.block_until_ready(fully_connected(x, weight, bias))
    y_ref = jnp.dot(x, weight.T, precision="highest") + bias
    assert y.shape == (batch, output_dim)
    assert jnp.allclose(y, y_ref, atol=2e-2, rtol=2e-2)

    # --- Multi-tile K (accumulation) and multi-tile N (parallel split) ------
    b2, k2, n2 = 32, 4096, 512
    kx2, kw2, kb2 = jax.random.split(jax.random.PRNGKey(1), 3)
    bound2 = 1.0 / (k2 ** 0.5)
    w2 = jax.random.uniform(kw2, (n2, k2), jnp.float32, minval=-bound2, maxval=bound2)
    bi2 = jax.random.uniform(kb2, (n2,), jnp.float32, minval=-bound2, maxval=bound2)
    x2 = jax.random.normal(kx2, (b2, k2), jnp.float32)

    y2 = jax.block_until_ready(fully_connected(x2, w2, bi2))
    y2_ref = jnp.dot(x2, w2.T, precision="highest") + bi2
    assert jnp.allclose(y2, y2_ref, atol=2e-2, rtol=2e-2)

    # --- bf16 output path (f32 scratch accumulator + epilogue cast) ---------
    b3, k3, n3 = 16, 256, 128
    kx3, kw3, kb3 = jax.random.split(jax.random.PRNGKey(2), 3)
    bound3 = 1.0 / (k3 ** 0.5)
    w3 = jax.random.uniform(kw3, (n3, k3), jnp.float32, minval=-bound3,
                            maxval=bound3).astype(jnp.bfloat16)
    bi3 = jax.random.uniform(kb3, (n3,), jnp.float32, minval=-bound3,
                             maxval=bound3).astype(jnp.bfloat16)
    x3 = jax.random.normal(kx3, (b3, k3), jnp.float32).astype(jnp.bfloat16)

    y3 = jax.block_until_ready(fully_connected(x3, w3, bi3))
    y3_ref = (jnp.dot(x3.astype(jnp.float32), w3.astype(jnp.float32).T,
                      precision="highest")
              + bi3.astype(jnp.float32))
    assert y3.dtype == jnp.bfloat16
    assert jnp.allclose(y3.astype(jnp.float32), y3_ref, atol=5e-2, rtol=5e-2)

    print("KERNEL_OK")
</pallas_src>

<mosaic_0001>
module attributes {stable_mosaic.version = 11 : i64} {
  func.func @_linear_kernel_f32(%arg0: i32, %arg1: i32, %arg2: i32, %arg3: memref<8x32xf32, #tpu.memory_space<vmem>>, %arg4: memref<16x32xf32, #tpu.memory_space<vmem>>, %arg5: memref<1x16xf32, #tpu.memory_space<vmem>>, %arg6: memref<8x16xf32, #tpu.memory_space<vmem>>) attributes {dimension_semantics = [#tpu.dimension_semantics<parallel>, #tpu.dimension_semantics<parallel>, #tpu.dimension_semantics<arbitrary>], iteration_bounds = array<i64: 1, 1, 1>, scalar_prefetch = 0 : i64, scratch_operands = 0 : i64, tpu.core_type = #tpu.core_type<tc>, window_params = [{transform_indices = @transform_0, window_bounds = array<i64: 8, 32>}, {transform_indices = @transform_1, window_bounds = array<i64: 16, 32>}, {transform_indices = @transform_2, window_bounds = array<i64: 1, 16>}, {transform_indices = @transform_3, window_bounds = array<i64: 8, 16>}]} {
    %c0 = arith.constant 0 : index
    %c0_0 = arith.constant 0 : index
    %0 = vector.load %arg3[%c0, %c0_0] : memref<8x32xf32, #tpu.memory_space<vmem>>, vector<8x32xf32>
    %c0_1 = arith.constant 0 : index
    %c0_2 = arith.constant 0 : index
    %1 = vector.load %arg4[%c0_1, %c0_2] : memref<16x32xf32, #tpu.memory_space<vmem>>, vector<16x32xf32>
    %cst = arith.constant dense<0.000000e+00> : vector<8x16xf32>
    %2 = tpu.matmul %0, %1, %cst {dimension_numbers = #tpu.dot_dimension_numbers<[1], [1], [0], [0], [0, 0, 1, 0], [], []>} : vector<8x32xf32>, vector<16x32xf32>, vector<8x16xf32> -> vector<8x16xf32>
    %c0_i32 = arith.constant 0 : i32
    %3 = arith.cmpi eq, %arg2, %c0_i32 : i32
    %4 = arith.extui %3 : i1 to i32
    %c0_i32_3 = arith.constant 0 : i32
    %5 = arith.cmpi ne, %4, %c0_i32_3 : i32
    scf.if %5 {
      %c0_6 = arith.constant 0 : index
      %c0_7 = arith.constant 0 : index
      %9 = vector.load %arg5[%c0_6, %c0_7] : memref<1x16xf32, #tpu.memory_space<vmem>>, vector<1x16xf32>
      %10 = vector.broadcast %9 : vector<1x16xf32> to vector<8x16xf32>
      %11 = arith.addf %2, %10 : vector<8x16xf32>
      %c0_8 = arith.constant 0 : index
      %c0_9 = arith.constant 0 : index
      %12 = vector.load %arg6[%c0_8, %c0_9] : memref<8x16xf32, #tpu.memory_space<vmem>>, vector<8x16xf32>
      tpu.vector_store %arg6[%c0_8, %c0_9], %11 {strides = array<i32>} : memref<8x16xf32, #tpu.memory_space<vmem>>, vector<8x16xf32>,
    } else {
    }
    %c0_i32_4 = arith.constant 0 : i32
    %6 = arith.cmpi ne, %arg2, %c0_i32_4 : i32
    %7 = arith.extui %6 : i1 to i32
    %c0_i32_5 = arith.constant 0 : i32
    %8 = arith.cmpi ne, %7, %c0_i32_5 : i32
    scf.if %8 {
      %c0_6 = arith.constant 0 : index
      %c0_7 = arith.constant 0 : index
      %9 = vector.load %arg6[%c0_6, %c0_7] : memref<8x16xf32, #tpu.memory_space<vmem>>, vector<8x16xf32>
      %10 = arith.addf %9, %2 : vector<8x16xf32>
      %c0_8 = arith.constant 0 : index
      %c0_9 = arith.constant 0 : index
      %11 = vector.load %arg6[%c0_8, %c0_9] : memref<8x16xf32, #tpu.memory_space<vmem>>, vector<8x16xf32>
      tpu.vector_store %arg6[%c0_8, %c0_9], %10 {strides = array<i32>} : memref<8x16xf32, #tpu.memory_space<vmem>>, vector<8x16xf32>,
    } else {
    }
    return
  }
  func.func @transform_0(%arg0: i32, %arg1: i32, %arg2: i32) -> (i32, i32) {
    %c0_i32 = arith.constant 0 : i32
    return %arg0, %arg2 : i32, i32
  }
  func.func @transform_1(%arg0: i32, %arg1: i32, %arg2: i32) -> (i32, i32) {
    %c0_i32 = arith.constant 0 : i32
    return %arg1, %arg2 : i32, i32
  }
  func.func @transform_2(%arg0: i32, %arg1: i32, %arg2: i32) -> (i32, i32) {
    %c0_i32 = arith.constant 0 : i32
    %c0_i32_0 = arith.constant 0 : i32
    return %c0_i32, %arg1 : i32, i32
  }
  func.func @transform_3(%arg0: i32, %arg1: i32, %arg2: i32) -> (i32, i32) {
    %c0_i32 = arith.constant 0 : i32
    return %arg0, %arg1 : i32, i32
  }
}

</mosaic_0001>

<bundles_post_ra>
// kernel: fully_connected.1
= control target key start
LH: loop header
LB: loop body
LE: loop exit
PB: predicated region body
PF: predicated region fallthrough
CT: control target
= control target key end

     0   :  { %8 = vsyncpa [#allocation3], 0  ;;  %s334_s0 = inlined_call_operand.hbm [shape: f32[8,32], index: 0, kind: input, shape index: {}]   ;;  %s335_s1 = inlined_call_operand.hbm [shape: f32[16,32], index: 1, kind: input, shape index: {}]   ;;  %s336_s2 = inlined_call_operand.vmem [shape: f32[1,16], index: 2, kind: input, shape index: {}]   ;;  %s337_s3 = inlined_call_operand.hbm [shape: f32[8,16], index: 3, kind: output, shape index: {}]  }
   0x1   :  { %9 = vsyncpa [#allocation6], 0 }
   0x2   :  { %10 = vsyncpa [#allocation4], 0  ;;  %s260_s12 = smov [#allocation2]   ;;  %s261_s14 = smov [#allocation5]  }
   0x3   :  { %s17_s13 = sshll.u32 %s260_s12, 4  ;;  %s26_s15 = sshll.u32 %s261_s14, 4  ;;  %s18_s13 = int_to_ptr.vmem [resolvable:$true] %s17_s13  ;;  %s288_s15 = int_to_ptr.vmem [resolvable:$true] %s26_s15 }
   0x4   :  { %s188_s18 = scalar_lea.hbm %s334_s0, 128 }
   0x5   :  { %p189_p0 = scmp.ne.s32.totalorder %s334_s0, %s188_s18  ;;  %p192_p1 = scmp.lt.u32.totalorder %s188_s18, %s334_s0 }
   0x7   :  { %p194_p2 = pnand %p192_p1, %p189_p0 }
   0x9   :  { %197 = shalt.err (!%p194_p2)
}
   0xa   :  { %s198_s23 = scalar_lea.vmem %s18_s13, 128  ;;  %p203_p4 = scmp.lt.s32.totalorder %s18_s13, %s18_s13 }
   0xb   :  { %p199_p3 = scmp.ne.s32.totalorder %s18_s13, %s198_s23  ;;  %p204_p5 = scmp.lt.s32.totalorder %s198_s23, %s198_s23 }
   0xd   :  { %p205_p6 = por %p204_p5, %p203_p4 }
   0xf   :  { %p206_p7 = pnand %p205_p6, %p199_p3 }
  0x11   :  { %209 = shalt.err (!%p206_p7)
}
  0x12   :  { %20 = dma.hbm_to_vmem [thread:$0]  %s334_s0, 128, %s18_s13, [#allocation3]  }
  0x13   :  { %s210_s28 = scalar_lea.hbm %s335_s1, 256 }
  0x14   :  { %p211_p8 = scmp.ne.s32.totalorder %s335_s1, %s210_s28  ;;  %p214_p9 = scmp.lt.u32.totalorder %s210_s28, %s335_s1 }
  0x16   :  { %p216_p10 = pnand %p214_p9, %p211_p8 }
  0x18   :  { %219 = shalt.err (!%p216_p10)
}
  0x19   :  { %s220_s6 = scalar_lea.vmem %s288_s15, 256  ;;  %p225_p12 = scmp.lt.s32.totalorder %s288_s15, %s288_s15 }
  0x1a   :  { %p221_p11 = scmp.ne.s32.totalorder %s288_s15, %s220_s6  ;;  %p226_p13 = scmp.lt.s32.totalorder %s220_s6, %s220_s6 }
  0x1c   :  { %p227_p0 = por %p226_p13, %p225_p12 }
  0x1e   :  { %p228_p1 = pnand %p227_p0, %p221_p11 }
  0x20   :  { %231 = shalt.err (!%p228_p1)
}
  0x21   :  { %s262_s0 = smov 128   ;;  %s263_s7 = smov 8  }
  0x22   :  { %32 = dma.hbm_to_vmem [thread:$0]  %s335_s1, 256, %s288_s15, [#allocation6], %s262_s0, %s262_s0, %s263_s7  }
  0x23   :  { %254 = dma.done.wait [#allocation3], 128  }
  0x24   :  { %255 = vsyncadd [#allocation3], 4294967168 }
  0x25   :  { %256 = dma.done.wait [#allocation6], 256  }
  0x26   :  { %257 = vsyncadd [#allocation6], 4294967040  ;;  %v264_v0 = vmov 0.0|0.0   ;;  %vm265_vm0 = vmmov 0   ;;  %v266_v1 = vmov 0.0   ;;  %vm44_vm1 = vcmask 261120  }
  0x27   :  { %176 = vmatprep.subr.bf16.mxu0 %v264_v0  ;;  %173 = vmatprep.mubr.msk.f32.mxu0 %vm265_vm0, %v266_v1  ;;  %v42_v2 = vld [vmem:[#allocation5] sm:$0xff]  ;;  %v43_v3 = vld [vmem:[#allocation5 + $0x8] sm:$0xff]  ;;  %vm178_vm2 = vmpackc.low %vm44_vm1, %vm44_vm1  ;;  %s267_s1 = smov [#allocation7]   ;;  %vm136_vm3 = vcmask 130048  }
  0x28   :  { %v177_v4 = vpack.c.bf16 %v43_v3, %v42_v2  ;;  %v41_v5 = vld [vmem:[#allocation2] sm:$0xff]  ;;  %s152_s12 = sshll.u32 %s267_s1, 4  ;;  %s153_s12 = int_to_ptr.vmem [resolvable:$true] %s152_s12 }
  0x29   :  { %v165_v6 = vld [vmem:[%s336_s2] ss:$0 sm:$0xff]  ;;  %s232_s13 = scalar_lea.vmem %s153_s12, 128  ;;  %p237_p3 = scmp.lt.s32.totalorder %s153_s12, %s153_s12 }
  0x2a   :  { %179 = vmatpush3.bf16.xpose.msk.msra.mxu0 %vm178_vm2, %v177_v4  ;;  %p233_p2 = scmp.ne.s32.totalorder %s153_s12, %s232_s13  ;;  %p238_p4 = scmp.lt.s32.totalorder %s232_s13, %s232_s13 }
  0x2c   :  { %p239_p5 = por %p238_p4, %p237_p3 }
  0x2e   :  { %p240_p6 = pnand %p239_p5, %p233_p2 }
  0x31   :  { %174 = vmatmul.mubr.msk.f32.vlgmr.msra.gmra.mrb[0].mxu0 %vm44_vm1, %v41_v5 }
 0x104   :  { %v120_v7 = vpop.f32.mrb[0].mxu0 }
 0x105   :  { %v135_v8 = vadd.f32 %v165_v6, %v120_v7  ;;  %v175_v9 = vpop.f32.mrb[1].mxu0 }
 0x107   :  { %137 = vst.msk [vmem:[#allocation7] sm:$0xff] %vm136_vm3, %v135_v8 }
 0x108   :  { %243 = shalt.err (!%p240_p6)
}
 0x109   :  { %s244_s16 = scalar_lea.hbm %s337_s3, 128 }
 0x10a   :  { %p245_p7 = scmp.ne.s32.totalorder %s337_s3, %s244_s16  ;;  %p248_p8 = scmp.lt.u32.totalorder %s244_s16, %s337_s3 }
 0x10c   :  { %p250_p9 = pnand %p248_p8, %p245_p7 }
 0x10e   :  { %253 = shalt.err (!%p250_p9)
}
 0x10f   :  { %155 = dma.vmem_to_hbm [thread:$0]  %s153_s12, 128, %s337_s3, [#allocation4]  }
 0x110   :  { %258 = dma.done.wait [#allocation4], 128  }
 0x111   :  { %259 = vsyncadd [#allocation4], 4294967168 }
 0x112   :  { %159 = vsyncpa [#allocation3], 1 }
 0x113   :  { %160 = vsyncpa [#allocation6], 1 }
 0x114   :  { %161 = vsyncpa [#allocation4], 1 }

</bundles_post_ra>
